<compile_context>
chip_gen: v7x
topology: tpu7x:2x2x1
jax: 0.10.0
libtpu: 0.0.40
codegen_flags: <defaults>
</compile_context>

<pallas_src>
import functools

import jax
import jax.numpy as jnp
from jax.experimental import pallas as pl
from jax.experimental.pallas import tpu as pltpu


def _patch_embed_kernel(x_ref, w_ref, b_ref, o_ref, *, precision):
    # x_ref: (tm, K) w_ref: (K, E) -- native dtype; b_ref: (1, E) f32; o_ref: (tm, E)
    acc = jnp.dot(x_ref[...], w_ref[...],
                  preferred_element_type=jnp.float32, precision=precision)
    o_ref[...] = (acc + b_ref[...]).astype(o_ref.dtype)


def _round_up(n, m):
    return ((n + m - 1) // m) * m


def _extract_patches(x, patch_size):
    """(B, C, H, W) -> (B*n_patches, C*P*P) with per-patch (c, ph, pw) ordering
    that matches Conv2d weight flattening (O, C, P, P) -> (O, C*P*P)."""
    B, C, H, W = x.shape
    P = patch_size
    hp, wp = H // P, W // P
    x = x.reshape(B, C, hp, P, wp, P)
    x = x.transpose(0, 2, 4, 1, 3, 5)          # (B, hp, wp, C, P, P)
    return x.reshape(B * hp * wp, C * P * P)


def patch_embedding_forward(x, w, b, *, patch_size, tm=None, compute_dtype=None,
                            precision=None):
    """PatchEmbedding forward.

    x: (B, C, H, W)
    w: (E, C, P, P)   -- PyTorch Conv2d weight layout
    b: (E,)           -- Conv2d bias
    compute_dtype: dtype fed to the MXU (pass jnp.bfloat16 on v6e/v7x for perf;
                   accumulation is always f32, output keeps x.dtype)
    precision: forwarded to jnp.dot.  Default (None) uses the TPU default matmul
               precision; pass jax.lax.Precision.HIGHEST for exact-f32 parity.
    returns (B, n_patches, E)
    """
    B, C, H, W = x.shape
    P = patch_size
    E = w.shape[0]
    hp, wp = H // P, W // P
    n_patches = hp * wp
    M = B * n_patches
    K = C * P * P

    out_dtype = x.dtype
    if compute_dtype is None:
        compute_dtype = x.dtype

    # TODO(synk): patch extraction is a reshape/transpose done by XLA in the
    # wrapper; fusing the gather into the kernel (blocking the NCHW image over
    # (B, hp) bands and re-laying out to (wp, K) in VMEM) would save one HBM
    # round-trip of the token matrix, but needs in-kernel relayouts Mosaic does
    # not lower cleanly today.
    x2d = _extract_patches(x, P).astype(compute_dtype)   # (M, K)
    w2d = w.reshape(E, K).T.astype(compute_dtype)        # (K, E)
    b2d = b.reshape(1, E).astype(jnp.float32)

    # Pad the contraction dim up to a lane multiple (128) so x-tile loads are
    # unmasked and the MXU contraction is full width.  No-op for standard ViT
    # (K = 3*16*16 = 768); zero columns/rows do not change the result.
    K_pad = _round_up(K, 128)
    if K_pad != K:
        x2d = jnp.pad(x2d, ((0, 0), (0, K_pad - K)))
        w2d = jnp.pad(w2d, ((0, K_pad - K), (0, 0)))

    itemsize = jnp.dtype(compute_dtype).itemsize
    out_itemsize = jnp.dtype(out_dtype).itemsize
    sub = 8 if itemsize >= 4 else 16                     # sublane granularity

    # Row tile: large tiles amortize the ~0.35us/grid-step overhead (512-1024
    # reaches ~85% of HBM roofline vs ~63% at 256).  For small M, split into
    # >=2 balanced steps so both TensorCores are used on v7x.
    M_sub = _round_up(M, sub)
    if tm is None:
        tm = 512
        if _round_up(min(tm, M_sub), sub) >= M_sub and M_sub > sub:
            tm = pl.cdiv(M_sub, 2)                       # 2 balanced steps
    tm = max(sub, _round_up(min(tm, M_sub), sub))
    grid_m = pl.cdiv(M, tm)
    # No row padding of x2d: Pallas masks the ragged last block; garbage rows in
    # the last input block only feed output rows that are never written.

    # VMEM budget: double-buffered x/out tiles + weight/bias (double-buffered by
    # default), with headroom, capped at ~75% of physical VMEM (leaves room for
    # compiler scratch; v7x physical VMEM is only 64 MiB).
    try:
        vmem_cap = int(pltpu.get_tpu_info().vmem_capacity_bytes)
    except Exception:
        vmem_cap = 64 * 1024 * 1024
    est = (2 * tm * K_pad * itemsize              # x tiles
           + 2 * tm * E * out_itemsize            # out tiles
           + 2 * (K_pad * E * itemsize + E * 4))  # weight + bias
    vmem_limit = int(min(max(2 * est, 16 * 1024 * 1024), (vmem_cap * 3) // 4))

    cost = pl.CostEstimate(
        flops=2 * M * K_pad * E,
        transcendentals=0,
        bytes_accessed=(x2d.size * itemsize + w2d.size * itemsize
                        + b2d.size * 4 + M * E * out_itemsize),
    )

    # NOTE: pipeline_mode=pl.Buffered(1) on the constant-index weight/bias specs
    # would halve their VMEM footprint, but only matters for very large E
    # (>= 2048 f32); left at the default.  Likewise pl.Buffered(3) on the x spec
    # is only worth adding if a profile shows exposed x DMA at this tm.
    out2d = pl.pallas_call(
        functools.partial(_patch_embed_kernel, precision=precision),
        out_shape=jax.ShapeDtypeStruct((M, E), out_dtype),
        grid_spec=pltpu.PrefetchScalarGridSpec(
            num_scalar_prefetch=0,
            grid=(grid_m,),
            in_specs=[
                pl.BlockSpec((tm, K_pad), lambda i: (i, 0)),   # patch rows (tiled)
                pl.BlockSpec((K_pad, E), lambda i: (0, 0)),    # projection weight
                pl.BlockSpec((1, E), lambda i: (0, 0)),        # bias
            ],
            out_specs=pl.BlockSpec((tm, E), lambda i: (i, 0)),
        ),
        compiler_params=pltpu.CompilerParams(
            dimension_semantics=("parallel",),
            vmem_limit_bytes=vmem_limit,
        ),
        cost_estimate=cost,
    )(x2d, w2d, b2d)

    return out2d.reshape(B, n_patches, E)


def _reference(x, w, b, patch_size):
    """Pure-JAX reference using a real strided convolution (PyTorch semantics)."""
    P = patch_size
    y = jax.lax.conv_general_dilated(
        x, w, window_strides=(P, P), padding="VALID",
        dimension_numbers=("NCHW", "OIHW", "NCHW"))
    y = y + b.reshape(1, -1, 1, 1)
    B, E, hp, wp = y.shape
    return y.reshape(B, E, hp * wp).transpose(0, 2, 1)   # (B, n_patches, E)


if __name__ == "__main__":
    # Small shapes consistent with the module defaults (in_chans=3), with a
    # lane-friendly embed dim.
    B, C, IMG, P, E = 2, 3, 16, 4, 128
    n_patches = (IMG // P) ** 2

    key = jax.random.PRNGKey(0)
    kx, kw, kb = jax.random.split(key, 3)

    x = jax.random.normal(kx, (B, C, IMG, IMG), dtype=jnp.float32)

    # Deterministic parameter init roughly matching nn.Conv2d scale.
    fan_in = C * P * P
    lim = 1.0 / (fan_in ** 0.5)
    w = jax.random.uniform(kw, (E, C, P, P), minval=-lim, maxval=lim,
                           dtype=jnp.float32)
    b = jax.random.uniform(kb, (E,), minval=-lim, maxval=lim, dtype=jnp.float32)

    ref = _reference(x, w, b, P)

    # 1) f32 operands (default TPU matmul precision, same as the conv reference).
    out = jax.block_until_ready(patch_embedding_forward(x, w, b, patch_size=P))
    assert out.shape == (B, n_patches, E), out.shape
    assert jnp.allclose(out, ref, atol=2e-5, rtol=2e-5), "f32 mismatch vs conv reference"

    # 2) Ragged row tiling (M=32, tm=24): exercises the masked partial last block
    #    that replaced the jnp.pad path.
    out_ragged = jax.block_until_ready(
        patch_embedding_forward(x, w, b, patch_size=P, tm=24))
    assert jnp.allclose(out_ragged, ref, atol=2e-5, rtol=2e-5), "ragged-tile mismatch"

    # 3) bf16 operand feed (recommended on v6e/v7x): f32 accumulation, so only
    #    operand-rounding error vs the f32 reference.
    out_bf16 = jax.block_until_ready(
        patch_embedding_forward(x, w, b, patch_size=P, compute_dtype=jnp.bfloat16))
    assert jnp.allclose(out_bf16, ref, atol=5e-2, rtol=5e-2), "bf16 mismatch vs conv reference"

    print("KERNEL_OK")
</pallas_src>

<mosaic_0001>
module attributes {stable_mosaic.version = 11 : i64} {
  func.func @_patch_embed_kernel(%arg0: i32, %arg1: memref<16x128xf32, #tpu.memory_space<vmem>>, %arg2: memref<128x128xf32, #tpu.memory_space<vmem>>, %arg3: memref<1x128xf32, #tpu.memory_space<vmem>>, %arg4: memref<16x128xf32, #tpu.memory_space<vmem>>) attributes {dimension_semantics = [#tpu.dimension_semantics<parallel>], iteration_bounds = array<i64: 2>, scalar_prefetch = 0 : i64, scratch_operands = 0 : i64, tpu.core_type = #tpu.core_type<tc>, window_params = [{transform_indices = @transform_0, window_bounds = array<i64: 16, 128>}, {pipeline_mode = #tpu.pipeline_mode<synchronous>, transform_indices = @transform_1, window_bounds = array<i64: 128, 128>}, {pipeline_mode = #tpu.pipeline_mode<synchronous>, transform_indices = @transform_2, window_bounds = array<i64: 1, 128>}, {transform_indices = @transform_3, window_bounds = array<i64: 16, 128>}]} {
    %c0 = arith.constant 0 : index
    %c0_0 = arith.constant 0 : index
    %0 = vector.load %arg1[%c0, %c0_0] : memref<16x128xf32, #tpu.memory_space<vmem>>, vector<16x128xf32>
    %c0_1 = arith.constant 0 : index
    %c0_2 = arith.constant 0 : index
    %1 = vector.load %arg2[%c0_1, %c0_2] : memref<128x128xf32, #tpu.memory_space<vmem>>, vector<128x128xf32>
    %cst = arith.constant dense<0.000000e+00> : vector<16x128xf32>
    %2 = tpu.matmul %0, %1, %cst {dimension_numbers = #tpu.dot_dimension_numbers<[1], [0], [0], [1], [0, 0, 1, 1], [], []>} : vector<16x128xf32>, vector<128x128xf32>, vector<16x128xf32> -> vector<16x128xf32>
    %c0_3 = arith.constant 0 : index
    %c0_4 = arith.constant 0 : index
    %3 = vector.load %arg3[%c0_3, %c0_4] : memref<1x128xf32, #tpu.memory_space<vmem>>, vector<1x128xf32>
    %4 = vector.broadcast %3 : vector<1x128xf32> to vector<16x128xf32>
    %5 = arith.addf %2, %4 : vector<16x128xf32>
    %c0_5 = arith.constant 0 : index
    %c0_6 = arith.constant 0 : index
    %6 = vector.load %arg4[%c0_5, %c0_6] : memref<16x128xf32, #tpu.memory_space<vmem>>, vector<16x128xf32>
    tpu.vector_store %arg4[%c0_5, %c0_6], %5 {strides = array<i32>} : memref<16x128xf32, #tpu.memory_space<vmem>>, vector<16x128xf32>,
    return
  }
  func.func @transform_0(%arg0: i32) -> (i32, i32) {
    %c0_i32 = arith.constant 0 : i32
    %c0_i32_0 = arith.constant 0 : i32
    return %arg0, %c0_i32 : i32, i32
  }
  func.func @transform_1(%arg0: i32) -> (i32, i32) {
    %c0_i32 = arith.constant 0 : i32
    %c0_i32_0 = arith.constant 0 : i32
    %c0_i32_1 = arith.constant 0 : i32
    return %c0_i32, %c0_i32_0 : i32, i32
  }
  func.func @transform_2(%arg0: i32) -> (i32, i32) {
    %c0_i32 = arith.constant 0 : i32
    %c0_i32_0 = arith.constant 0 : i32
    %c0_i32_1 = arith.constant 0 : i32
    return %c0_i32, %c0_i32_0 : i32, i32
  }
  func.func @transform_3(%arg0: i32) -> (i32, i32) {
    %c0_i32 = arith.constant 0 : i32
    %c0_i32_0 = arith.constant 0 : i32
    return %arg0, %c0_i32 : i32, i32
  }
}

</mosaic_0001>

<bundles_post_ra>
// kernel: tpu_custom_call.1
= control target key start
LH: loop header
LB: loop body
LE: loop exit
PB: predicated region body
PF: predicated region fallthrough
CT: control target
= control target key end

     0   :  { %8 = vsyncpa [#allocation3], 0  ;;  %s945_s0 = inlined_call_operand.hbm [shape: f32[32,128], index: 0, kind: input, shape index: {}]   ;;  %s946_s1 = inlined_call_operand.hbm [shape: f32[128,128], index: 1, kind: input, shape index: {}]   ;;  %s947_s2 = inlined_call_operand.vmem [shape: f32[1,128], index: 2, kind: input, shape index: {}]   ;;  %s948_s3 = inlined_call_operand.hbm [shape: f32[32,128], index: 3, kind: output, shape index: {}]  }
   0x1   :  { %10 = vsyncpa [#allocation3 + $0x1], 0 }
   0x2   :  { %11 = vsyncpa [#allocation6], 0 }
   0x3   :  { %12 = vsyncpa [#allocation4], 0 }
   0x4   :  { %14 = vsyncpa [#allocation4 + $0x1], 0  ;;  %s727_s12 = smov 0   ;;  %s729_s13 = smov 0  }
   0x5   :  { %s731_s14 = smov 0   ;;  %s733_s15 = smov 0  }
   0x6 LB: > { %s748_s16 = sadd.s32 4294967295, %s698_s15   ;;  %s405_s17 = sadd.s32 4294967294, %s698_s15   ;;  %s698_s15 = sphi %s733_s15, %s968_s15   ;;  %s694_s14 = sphi %s731_s14, %s967_s14   ;;  %s690_s13 = sphi %s729_s13, %s966_s13   ;;  %s686_s12 = sphi %s727_s12, %s965_s12  }
   0x7   : > { %p40_p0 = scmp.ne.s32.totalorder %s690_s13, %s686_s12  ;;  %p949_p1 = scmp.eq.s32.totalorder %s748_s16, 0 }
   0x8   : > { %p112_p3 = scmp.eq.s32.totalorder %s405_s17, 1  ;;  %p406_p5 = scmp.ge.s32.totalorder %s698_s15, 1 }
   0x9   : > { %p757_p4 = por %p949_p1, %p40_p0  ;;  %p119_p7 = scmp.lt.s32.totalorder %s698_s15, 3 }
   0xa   : > { %p762_p6 = por %p112_p3, %p40_p0  ;;  %s700_s21 = smov [#allocation5]  }
   0xb   : > { %s952_s18 = scalar_select %p757_p4, 1, 0 }
   0xc   : > { %s953_s19 = scalar_select %p762_p6, 1, 0 }
   0xd   : > { %p767_p8 = pnand %p406_p5, %p119_p7  ;;  %s131_s22 = sshll.u32 %s700_s21, 4  ;;  %s771_s22 = int_to_ptr.vmem [resolvable:$true] %s131_s22 }
   0xe   : > { %s783_s24 = sadd.s32 1, %s698_s15   ;;  %s27_s25 = sadd.s32 1, %s694_s14 }
   0xf   : > { %s954_s20 = scalar_select %p767_p8, 1, 0 }
  0x10   : > { %p517_p9 = pneg %p767_p8  ;;  %s24_s26 = ssub.s32 %s698_s15, %s783_s24 }
  0x11   : > { %s570_s29 = scalar_lea.hbm %s946_s1, 2048 }
  0x12   : > { %p778_p11 = pnand %p517_p9, %p949_p1  ;;  %p571_p12 = scmp.ne.s32.totalorder %s946_s1, %s570_s29 }
  0x13   : > { %p577_p5 = scmp.lt.u32.totalorder %s570_s29, %s946_s1 }
  0x14   : > { %p572_p13 = pneg %p778_p11 }
  0x16   : > { %p573_p0 = pnand %p572_p13, %p571_p12 }
  0x18   : > { %p574_p3 = pneg %p573_p0 }
  0x1a   : > { %p579_p7 = pnand %p577_p5, %p574_p3 }
  0x1c   : > { %582 = shalt.err (!%p579_p7)
}
  0x1d   : > { %s583_s7 = scalar_lea.vmem %s771_s22, 2048  ;;  %p591_p2 = scmp.lt.s32.totalorder %s771_s22, %s771_s22 }
  0x1e   : > { %p584_p9 = scmp.ne.s32.totalorder %s771_s22, %s583_s7  ;;  %p592_p6 = scmp.lt.s32.totalorder %s583_s7, %s583_s7 }
  0x20   : > { %p586_p10 = pnand %p584_p9, %p572_p13  ;;  %p593_p4 = por %p592_p6, %p591_p2 }
  0x22   : > { %p587_p1 = pneg %p586_p10 }
  0x24   : > { %p594_p8 = pnand %p593_p4, %p587_p1 }
  0x26   : > { %597 = shalt.err (!%p594_p8)
}
  0x27   : > { %s701_s8 = smov 128   ;;  %s702_s9 = smov 8  }
  0x28   : > { %520 = dma.hbm_to_vmem [thread:$0]  (!%p778_p11), %s946_s1, 2048, %s771_s22, [#allocation6], %s701_s8, %s701_s8, %s702_s9  }
  0x29   : > { %p25_p1 = scmp.eq.s32.totalorder %s24_s26, 0  ;;  %p34_p2 = scmp.ne.s32.totalorder %s694_s14, %s690_s13 }
  0x2a   : > { %p35_p4 = scmp.eq.s32.totalorder %s698_s15, 0  ;;  %p530_p6 = scmp.lt.s32.totalorder %s698_s15, 2 }
  0x2b   : > { %s817_s17 = scalar_select %p25_p1, %s694_s14, %s27_s25  }
  0x2c   : > { %p36_p8 = por %p35_p4, %p34_p2  ;;  %p956_p10 = scmp.eq.s32.totalorder %s748_s16, 1 }
  0x2d   : > { %s148_s23 = sand.u32 1, %s694_s14   ;;  %s422_s27 = sshll.u32 %s698_s15, 8 }
  0x2e   : > { %p821_p12 = por %p956_p10, %p34_p2  ;;  %s409_s28 = sshll.u32 %s148_s23, 4 }
  0x2f   : > { %s830_s4 = scalar_lea.hbm %s945_s0, %s422_s27  ;;  %s152_s22 = scalar_lea.vmem [#allocation2], %s409_s28 }
  0x30   : > { %s159_s25 = sshll.u32 %s152_s22, 4  ;;  %p832_p11 = pnand %p530_p6, %p36_p8  ;;  %s836_s25 = int_to_ptr.vmem [resolvable:$true] %s159_s25 }
  0x31   : > { %s838_s5 = scalar_lea.sflag [#allocation3], %s148_s23  ;;  %s598_s6 = scalar_lea.hbm %s830_s4, 256 }
  0x32   : > { %p599_p13 = scmp.ne.s32.totalorder %s830_s4, %s598_s6  ;;  %p600_p0 = pneg %p832_p11 }
  0x33   : > { %s603_s11 = scalar_lea.hbm %s945_s0, 512  ;;  %p604_p7 = scmp.lt.u32.totalorder %s830_s4, %s945_s0 }
  0x34   : > { %p601_p3 = pnand %p600_p0, %p599_p13  ;;  %p605_p9 = scmp.lt.u32.totalorder %s603_s11, %s598_s6 }
  0x35   : > { %p607_p2 = scmp.lt.u32.totalorder %s598_s6, %s830_s4 }
  0x36   : > { %p602_p5 = pneg %p601_p3  ;;  %p606_p1 = por %p605_p9, %p604_p7 }
  0x38   : > { %p608_p4 = por %p607_p2, %p606_p1 }
  0x3a   : > { %p609_p6 = pnand %p608_p4, %p602_p5 }
  0x3c   : > { %612 = shalt.err (!%p609_p6)
}
  0x3d   : > { %s613_s23 = scalar_lea.vmem %s836_s25, 256  ;;  %s703_s29 = smov [#allocation2]  }
  0x3e   : > { %p614_p8 = scmp.ne.s32.totalorder %s836_s25, %s613_s23  ;;  %s618_s30 = sshll.u32 %s703_s29, 4  ;;  %s619_s30 = int_to_ptr.vmem [resolvable:$false] %s618_s30 }
  0x3f   : > { %s620_s22 = scalar_lea.vmem %s619_s30, 512  ;;  %p621_p3 = scmp.lt.s32.totalorder %s836_s25, %s619_s30 }
  0x40   : > { %p616_p10 = pnand %p614_p8, %p600_p0  ;;  %p622_p7 = scmp.lt.s32.totalorder %s620_s22, %s613_s23 }
  0x42   : > { %p617_p13 = pneg %p616_p10  ;;  %p623_p9 = por %p622_p7, %p621_p3 }
  0x44   : > { %p624_p1 = pnand %p623_p9, %p617_p13 }
  0x46   : > { %627 = shalt.err (!%p624_p1)
}
  0x47   : > { %524 = dma.hbm_to_vmem [thread:$0]  (!%p832_p11), %s830_s4, 256, %s836_s25, %s838_s5, %s701_s8, %s701_s8, %s702_s9  }
  0x48   : > { %p959_p0 = scmp.ne.s32.totalorder %s954_s20, 0 }
  0x49   : > { %s872_s6 = sand.u32 (!%p959_p0), 1, %s690_s13   ;;  %p960_p5 = scmp.ne.s32.totalorder (!%p959_p0), %s952_s18, 0 }
  0x4a   : > { %171 = sbr.rel (%p959_p0) target bundleno = 350 (0x15e), region = 32  ;;  %s413_s7 = sshll.u32 (!%p959_p0), %s872_s6, 4 }
  0x4b   : > { %s174_s10 = scalar_lea.sflag (!%p959_p0), [#allocation3], %s872_s6  ;;  %s878_s26 = scalar_lea.vmem (!%p959_p0), [#allocation2], %s413_s7 }
  0x51   : > { %673 = dma.done.wait (%p960_p5), %s174_s10, 256  }
  0x52   : > { %675 = vsyncadd (%p960_p5), %s174_s10, 4294967040  ;;  %p961_p11 = scmp.eq.s32.totalorder %s748_s16, 0 }
  0x54   : > { %677 = dma.done.wait (%p961_p11), [#allocation6], 2048   ;;  %p962_p2 = pmov %p961_p11 }
  0x55   : > { %v208_v0 = vld [vmem:[#allocation5] sm:$0xff]  ;;  %v209_v1 = vld [vmem:[#allocation5 + $0x8] sm:$0xff]  ;;  %v210_v2 = vld [vmem:[#allocation5 + $0x10] sm:$0xff]  ;;  %s203_s18 = scalar_lea.vmem [#allocation7], %s413_s7  ;;  %s423_s4 = sshll.u32 %s748_s16, 8 }
  0x56   : > { %679 = vsyncadd (%p962_p2), [#allocation6], 4294965248  ;;  %v477_v3 = vpack.c.bf16 %v209_v1, %v208_v0  ;;  %v211_v4 = vld [vmem:[#allocation5 + $0x18] sm:$0xff]  ;;  %v212_v6 = vld [vmem:[#allocation5 + $0x20] sm:$0xff]  ;;  %s322_s20 = sshll.u32 %s203_s18, 4  ;;  %s901_s11 = scalar_lea.hbm %s948_s3, %s423_s4  ;;  %s896_s20 = int_to_ptr.vmem [resolvable:$true] %s322_s20 }
  0x57   : > { %v481_v5 = vpack.c.bf16 %v211_v4, %v210_v2  ;;  %v213_v7 = vld [vmem:[#allocation5 + $0x28] sm:$0xff]  ;;  %v206_v9 = vld [vmem:[%s878_s26] sm:$0xff]  ;;  %v215_v11 = vld [vmem:[#allocation5 + $0x38] sm:$0xff]  ;;  %s309_s27 = scalar_lea.sflag [#allocation4], %s872_s6  ;;  %s628_s28 = scalar_lea.vmem %s896_s20, 256 }
  0x58   : > { %478 = vmatprep.subr.bf16.mxu0 %v477_v3  ;;  %v485_v8 = vpack.c.bf16 %v213_v7, %v212_v6  ;;  %v214_v10 = vld [vmem:[#allocation5 + $0x30] sm:$0xff]  ;;  %474 = vmatprep.mubr.f32.mxu0 %v206_v9  ;;  %v216_v13 = vld [vmem:[#allocation5 + $0x40] sm:$0xff]  ;;  %v217_v14 = vld [vmem:[#allocation5 + $0x48] sm:$0xff]  ;;  %p629_p4 = scmp.ne.s32.totalorder %s896_s20, %s628_s28  ;;  %s704_s16 = smov [#allocation7]  }
  0x59   : > { %480 = vmatpush3.bf16.msra.mxu0 %v477_v3  ;;  %v489_v12 = vpack.c.bf16 %v215_v11, %v214_v10  ;;  %v493_v15 = vpack.c.bf16 %v217_v14, %v216_v13  ;;  %v218_v16 = vld [vmem:[#allocation5 + $0x50] sm:$0xff]  ;;  %v219_v17 = vld [vmem:[#allocation5 + $0x58] sm:$0xff]  ;;  %v220_v19 = vld [vmem:[#allocation5 + $0x60] sm:$0xff]  ;;  %s632_s23 = sshll.u32 %s704_s16, 4  ;;  %s633_s23 = int_to_ptr.vmem [resolvable:$false] %s632_s23 }
  0x5a   : > { %482 = vmatprep.subr.bf16.mxu0 %v481_v5  ;;  %v497_v18 = vpack.c.bf16 %v219_v17, %v218_v16  ;;  %v221_v20 = vld [vmem:[#allocation5 + $0x68] sm:$0xff]  ;;  %v222_v22 = vld [vmem:[#allocation5 + $0x70] sm:$0xff]  ;;  %v223_v23 = vld [vmem:[#allocation5 + $0x78] sm:$0xff]  ;;  %p630_p6 = pnand %p629_p4, %p821_p12  ;;  %s634_s29 = scalar_lea.vmem %s633_s23, 512 }
  0x5b   : > { %v501_v21 = vpack.c.bf16 %v221_v20, %v220_v19  ;;  %v505_v24 = vpack.c.bf16 %v223_v23, %v222_v22  ;;  %v207_v25 = vld [vmem:[%s878_s26 + $0x8] sm:$0xff]  ;;  %v416_v26 = vld [vmem:[%s947_s2] ss:$0 sm:$0xff]  ;;  %p635_p10 = scmp.lt.s32.totalorder %s896_s20, %s633_s23  ;;  %p636_p13 = scmp.lt.s32.totalorder %s634_s29, %s628_s28 }
  0x5c   : > { %p631_p8 = pneg %p630_p6 }
  0x5d   : > { %484 = vmatpush3.bf16.msra.mxu0 %v481_v5  ;;  %p637_p3 = por %p636_p13, %p635_p10 }
  0x5e   : > { %486 = vmatprep.subr.bf16.mxu0 %v485_v8 }
  0x5f   : > { %p638_p7 = pnand %p637_p3, %p631_p8 }
  0x61   : > { %488 = vmatpush3.bf16.msra.mxu0 %v485_v8 }
  0x62   : > { %490 = vmatprep.subr.bf16.mxu0 %v489_v12 }
  0x65   : > { %492 = vmatpush3.bf16.msra.mxu0 %v489_v12 }
  0x66   : > { %494 = vmatprep.subr.bf16.mxu0 %v493_v15 }
  0x69   : > { %496 = vmatpush3.bf16.msra.mxu0 %v493_v15 }
  0x6a   : > { %498 = vmatprep.subr.bf16.mxu0 %v497_v18 }
  0x6d   : > { %500 = vmatpush3.bf16.msra.mxu0 %v497_v18 }
  0x6e   : > { %502 = vmatprep.subr.bf16.mxu0 %v501_v21 }
  0x71   : > { %504 = vmatpush3.bf16.msra.mxu0 %v501_v21 }
  0x72   : > { %506 = vmatprep.subr.bf16.mxu0 %v505_v24 }
  0x75   : > { %508 = vmatpush3.bf16.msra.mxu0 %v505_v24 }
  0x78   : > { %475 = vmatmul.mubr.f32.vlgmr.msra.gmra.mrb[0].mxu0 %v207_v25 }
 0x14b   : > { %v476_v27 = vpop.f32.mrb[0].mxu0 }
 0x14c   : > { %v303_v28 = vadd.f32 %v476_v27, %v416_v26  ;;  %v297_v29 = vpop.f32.mrb[1].mxu0 }
 0x14d   : > { %v298_v30 = vadd.f32 %v416_v26, %v297_v29 }
 0x14e   : > { %307 = vst [vmem:[%s203_s18 + $0x8] sm:$0xff] %v303_v28 }
 0x14f   : > { %306 = vst [vmem:[%s203_s18] sm:$0xff] %v298_v30 }
 0x150   : > { %641 = shalt.err (!%p638_p7)
}
 0x151   : > { %s642_s30 = scalar_lea.hbm %s901_s11, 256  ;;  %s646_s10 = scalar_lea.hbm %s948_s3, 512 }
 0x152   : > { %p643_p9 = scmp.ne.s32.totalorder %s901_s11, %s642_s30  ;;  %p647_p5 = scmp.lt.u32.totalorder %s901_s11, %s948_s3 }
 0x153   : > { %p648_p11 = scmp.lt.u32.totalorder %s646_s10, %s642_s30  ;;  %p650_p4 = scmp.lt.u32.totalorder %s642_s30, %s901_s11 }
 0x154   : > { %p644_p1 = pnand %p643_p9, %p821_p12 }
 0x155   : > { %p649_p2 = por %p648_p11, %p647_p5 }
 0x156   : > { %p645_p0 = pneg %p644_p1 }
 0x157   : > { %p651_p6 = por %p650_p4, %p649_p2 }
 0x159   : > { %p652_p8 = pnand %p651_p6, %p645_p0 }
 0x15b   : > { %655 = shalt.err (!%p652_p8)
}
 0x15c   : > { %s705_s8 = smov 128   ;;  %s706_s9 = smov 8  }
 0x15d   : > { %515 = dma.vmem_to_hbm [thread:$0]  (%p821_p12), %s896_s20, 256, %s901_s11, %s309_s27, %s705_s8, %s705_s8, %s706_s9  }
 0x15e PF: > { %s337_s4 = sand.u32 1, %s686_s12   ;;  %p963_p10 = scmp.ne.s32.totalorder %s953_s19, 0 }
 0x15f   : > { %p964_p13 = scmp.ge.s32.totalorder %s698_s15, 2  ;;  %s338_s25 = scalar_lea.sflag [#allocation4], %s337_s4 }
 0x161   : > { %p526_p3 = pnand %p964_p13, %p963_p10 }
 0x163   : > { %681 = dma.done.wait (!%p526_p3), %s338_s25, 256  }
 0x164   : > { %683 = vsyncadd (!%p526_p3), %s338_s25, 4294967040  ;;  %p17_p7 = scmp.ge.s32.totalorder %s783_s24, 4   ;;  %s965_s12 = smov %s690_s13 }
 0x165   : > { %s966_s13 = smov %s694_s14  ;;  %s967_s14 = smov %s817_s17 }
 0x166   : > { %s968_s15 = smov %s783_s24  ;;  %19 = sbr.rel (!%p17_p7) target bundleno = 6 (0x6), region = 81 }
 0x16d   :  { %343 = vsyncpa [#allocation3], 1 }
 0x16e   :  { %345 = vsyncpa [#allocation3 + $0x1], 1 }
 0x16f   :  { %346 = vsyncpa [#allocation6], 1 }
 0x170   :  { %347 = vsyncpa [#allocation4], 1 }
 0x171   :  { %349 = vsyncpa [#allocation4 + $0x1], 1 }

</bundles_post_ra>
